<compile_context>
chip_gen: v6e
topology: v6e:2x2x1
jax: 0.10.0
libtpu: 0.0.40
codegen_flags: <defaults>
</compile_context>

<pallas_src>
import functools

import jax
import jax.numpy as jnp
from jax import lax
from jax.experimental import pallas as pl
from jax.experimental.pallas import tpu as pltpu


def rnn_lang_kernel(tokens_ref, w1h_ref, w1e_ref, b1_ref, w2_ref, b2_ref,
                    out_ref, tok_proj_ref, *, seq_len):
    """Recurrence + final projection for one (padded) batch.

    tokens_ref:   (S, B, E) f32   time-major padded token embeddings
    w1h_ref:      (H, H)    f32   transposed l1 weight slice acting on hidden state
    w1e_ref:      (E, H)    f32   transposed l1 weight slice acting on embedding
    b1_ref:       (1, H)    f32
    w2_ref:       (H, V)    f32   transposed l2 weight
    b2_ref:       (1, V)    f32
    out_ref:      (B, V)    f32   lane-dense (V % 128 == 0) logits of last step
    tok_proj_ref: (S, B, H) f32   VMEM scratch for the hoisted input projection
    """
    S = seq_len
    B = tokens_ref.shape[1]
    E = tokens_ref.shape[2]
    H = w1h_ref.shape[0]

    # --- Hoisted input projection (one large MXU matmul, bias folded in). ---
    toks = tokens_ref[...].reshape(S * B, E)                       # (S*B, E)
    proj = jnp.dot(toks, w1e_ref[...],
                   preferred_element_type=jnp.float32) + b1_ref[...]
    tok_proj_ref[...] = proj.reshape(S, B, H)

    # --- Serial recurrence: one MXU push + one EUP op per step. ---
    w1h = w1h_ref[...]
    h0 = jnp.zeros((B, H), dtype=jnp.float32)

    def step(t, h):
        z = jnp.dot(h, w1h, preferred_element_type=jnp.float32) + tok_proj_ref[t]
        # sigmoid(z) == 0.5 * (tanh(0.5 * z) + 1): single EUP transcendental.
        return 0.5 * (jnp.tanh(0.5 * z) + 1.0)

    h_final = lax.fori_loop(0, S, step, h0, unroll=min(S, 8))

    # --- Final vocab projection (lane-dense store). ---
    # TODO(synk): at real vocab sizes, tile W2 over V with a parallel grid axis
    # (separate from the serial recurrence) so v7x's second TensorCore is used and
    # W2 streams HBM->VMEM instead of being fully resident.
    logits = jnp.dot(h_final, w2_ref[...],
                     preferred_element_type=jnp.float32) + b2_ref[...]
    out_ref[...] = logits.astype(out_ref.dtype)


def _round_up(x, m):
    return ((x + m - 1) // m) * m


def rnn_lang_model(input_ids, embed_table, W1, b1, W2, b2):
    """JAX wrapper reproducing RNNLangModel.forward.

    input_ids:   (B, S) int32 token ids
    embed_table: (V, E) f32
    W1:          (H, E + H) f32   (PyTorch nn.Linear weight)
    b1:          (H,) f32
    W2:          (V, H) f32
    b2:          (V,) f32
    returns:     (B, V) f32 logits for the last timestep
    """
    B, S = input_ids.shape
    V, E = embed_table.shape
    H = W1.shape[0]

    # Hardware-tile padding: sublane 8 for batch, lane 128 for E/H/V.
    B_pad = max(_round_up(B, 8), 8)
    E_pad = _round_up(E, 128)
    H_pad = _round_up(H, 128)
    V_pad = _round_up(V, 128)

    # Glue: embedding gather + time-major transpose + zero padding.
    # TODO(synk): for large vocab/embed, move the gather in-kernel via
    # PrefetchScalarGridSpec + pl.Element row gather instead of materializing tokens.
    tokens = jnp.take(embed_table, input_ids, axis=0).astype(jnp.float32)   # (B, S, E)
    tokens = jnp.transpose(tokens, (1, 0, 2))                               # (S, B, E)
    tokens = jnp.pad(tokens, ((0, 0), (0, B_pad - B), (0, E_pad - E)))

    # concat order in PyTorch is [prev_hidden, w] -> first H columns of W1 hit hidden.
    W1h_T = jnp.pad(jnp.transpose(W1[:, :H]).astype(jnp.float32),
                    ((0, H_pad - H), (0, H_pad - H)))                       # (H_pad, H_pad)
    W1e_T = jnp.pad(jnp.transpose(W1[:, H:]).astype(jnp.float32),
                    ((0, E_pad - E), (0, H_pad - H)))                       # (E_pad, H_pad)
    W2_T = jnp.pad(jnp.transpose(W2).astype(jnp.float32),
                   ((0, H_pad - H), (0, V_pad - V)))                        # (H_pad, V_pad)
    b1_p = jnp.pad(b1.astype(jnp.float32), (0, H_pad - H)).reshape(1, H_pad)
    b2_p = jnp.pad(b2.astype(jnp.float32), (0, V_pad - V)).reshape(1, V_pad)

    vmem_spec = pl.BlockSpec(memory_space=pltpu.MemorySpace.VMEM)

    out_padded = pl.pallas_call(
        functools.partial(rnn_lang_kernel, seq_len=S),
        out_shape=jax.ShapeDtypeStruct((B_pad, V_pad), jnp.float32),
        in_specs=[vmem_spec] * 6,
        out_specs=vmem_spec,
        scratch_shapes=[pltpu.VMEM((S, B_pad, H_pad), jnp.float32)],
    )(tokens, W1h_T, W1e_T, b1_p, W2_T, b2_p)

    return out_padded[:B, :V]


def _reference_forward(input_ids, embed_table, W1, b1, W2, b2):
    """Pure-JAX reference matching the PyTorch loop exactly."""
    B, S = input_ids.shape
    H = W1.shape[0]
    tokens = jnp.take(embed_table, input_ids, axis=0)  # (B, S, E)
    h = jnp.zeros((B, H), jnp.float32)
    for t in range(S):
        w = tokens[:, t, :]
        x = jnp.concatenate([h, w], axis=1)
        h = jax.nn.sigmoid(x @ W1.T + b1)
    return h @ W2.T + b2


if __name__ == "__main__":
    # Small, deterministic config.
    batch, seq_len = 2, 8
    embed_dim, hidden_units, vocab_size = 16, 32, 64

    key = jax.random.PRNGKey(0)
    k_emb, k_w1, k_b1, k_w2, k_b2, k_ids = jax.random.split(key, 6)

    embed_table = jax.random.normal(k_emb, (vocab_size, embed_dim), jnp.float32) * 0.1
    W1 = jax.random.normal(k_w1, (hidden_units, embed_dim + hidden_units), jnp.float32) * 0.1
    b1 = jax.random.normal(k_b1, (hidden_units,), jnp.float32) * 0.1
    W2 = jax.random.normal(k_w2, (vocab_size, hidden_units), jnp.float32) * 0.1
    b2 = jax.random.normal(k_b2, (vocab_size,), jnp.float32) * 0.1

    input_ids = jax.random.randint(k_ids, (batch, seq_len), 0, vocab_size, jnp.int32)

    out = rnn_lang_model(input_ids, embed_table, W1, b1, W2, b2)
    out = jax.block_until_ready(out)

    ref = _reference_forward(input_ids, embed_table, W1, b1, W2, b2)
    assert out.shape == (batch, vocab_size)
    assert jnp.allclose(out, ref, atol=2e-5, rtol=2e-5), "mismatch vs reference"

    print("KERNEL_OK")
</pallas_src>

<mosaic_0001>
module attributes {stable_mosaic.version = 11 : i64} {
  func.func @rnn_lang_kernel(%arg0: memref<8x8x128xf32, #tpu.memory_space<vmem>>, %arg1: memref<128x128xf32, #tpu.memory_space<vmem>>, %arg2: memref<128x128xf32, #tpu.memory_space<vmem>>, %arg3: memref<1x128xf32, #tpu.memory_space<vmem>>, %arg4: memref<128x128xf32, #tpu.memory_space<vmem>>, %arg5: memref<1x128xf32, #tpu.memory_space<vmem>>, %arg6: memref<8x128xf32, #tpu.memory_space<vmem>>, %arg7: memref<8x8x128xf32, #tpu.memory_space<vmem>>) attributes {dimension_semantics = [], scalar_prefetch = 0 : i64, scratch_operands = 1 : i64, tpu.core_type = #tpu.core_type<tc>} {
    %c0 = arith.constant 0 : index
    %c0_0 = arith.constant 0 : index
    %c0_1 = arith.constant 0 : index
    %0 = vector.load %arg0[%c0, %c0_0, %c0_1] : memref<8x8x128xf32, #tpu.memory_space<vmem>>, vector<8x8x128xf32>
    %1 = vector.shape_cast %0 : vector<8x8x128xf32> to vector<64x128xf32>
    %c0_2 = arith.constant 0 : index
    %c0_3 = arith.constant 0 : index
    %2 = vector.load %arg2[%c0_2, %c0_3] : memref<128x128xf32, #tpu.memory_space<vmem>>, vector<128x128xf32>
    %cst = arith.constant dense<0.000000e+00> : vector<64x128xf32>
    %3 = tpu.matmul %1, %2, %cst {dimension_numbers = #tpu.dot_dimension_numbers<[1], [0], [0], [1], [0, 0, 1, 1], [], []>} : vector<64x128xf32>, vector<128x128xf32>, vector<64x128xf32> -> vector<64x128xf32>
    %c0_4 = arith.constant 0 : index
    %c0_5 = arith.constant 0 : index
    %4 = vector.load %arg3[%c0_4, %c0_5] : memref<1x128xf32, #tpu.memory_space<vmem>>, vector<1x128xf32>
    %5 = vector.broadcast %4 : vector<1x128xf32> to vector<64x128xf32>
    %6 = arith.addf %3, %5 : vector<64x128xf32>
    %7 = vector.shape_cast %6 : vector<64x128xf32> to vector<8x8x128xf32>
    %c0_6 = arith.constant 0 : index
    %c0_7 = arith.constant 0 : index
    %c0_8 = arith.constant 0 : index
    %8 = vector.load %arg7[%c0_6, %c0_7, %c0_8] : memref<8x8x128xf32, #tpu.memory_space<vmem>>, vector<8x8x128xf32>
    tpu.vector_store %arg7[%c0_6, %c0_7, %c0_8], %7 {strides = array<i32>} : memref<8x8x128xf32, #tpu.memory_space<vmem>>, vector<8x8x128xf32>,
    %c0_9 = arith.constant 0 : index
    %c0_10 = arith.constant 0 : index
    %9 = vector.load %arg1[%c0_9, %c0_10] : memref<128x128xf32, #tpu.memory_space<vmem>>, vector<128x128xf32>
    %cst_11 = arith.constant 0.000000e+00 : f32
    %10 = vector.broadcast %cst_11 : f32 to vector<8x128xf32>
    %c0_i32 = arith.constant 0 : i32
    %cst_12 = arith.constant dense<0.000000e+00> : vector<8x128xf32>
    %11 = tpu.matmul %10, %9, %cst_12 {dimension_numbers = #tpu.dot_dimension_numbers<[1], [0], [0], [1], [0, 0, 1, 1], [], []>} : vector<8x128xf32>, vector<128x128xf32>, vector<8x128xf32> -> vector<8x128xf32>
    %12 = arith.index_cast %c0_i32 : i32 to index
    %c0_13 = arith.constant 0 : index
    %c0_14 = arith.constant 0 : index
    %13 = vector.load %arg7[%12, %c0_13, %c0_14] : memref<8x8x128xf32, #tpu.memory_space<vmem>>, vector<1x8x128xf32>
    %14 = vector.shape_cast %13 : vector<1x8x128xf32> to vector<8x128xf32>
    %15 = arith.addf %11, %14 : vector<8x128xf32>
    %cst_15 = arith.constant 5.000000e-01 : f32
    %16 = vector.broadcast %cst_15 : f32 to vector<8x128xf32>
    %17 = arith.mulf %16, %15 : vector<8x128xf32>
    %18 = math.tanh %17 : vector<8x128xf32>
    %cst_16 = arith.constant 1.000000e+00 : f32
    %19 = vector.broadcast %cst_16 : f32 to vector<8x128xf32>
    %20 = arith.addf %18, %19 : vector<8x128xf32>
    %cst_17 = arith.constant 5.000000e-01 : f32
    %21 = vector.broadcast %cst_17 : f32 to vector<8x128xf32>
    %22 = arith.mulf %21, %20 : vector<8x128xf32>
    %c1_i32 = arith.constant 1 : i32
    %cst_18 = arith.constant dense<0.000000e+00> : vector<8x128xf32>
    %23 = tpu.matmul %22, %9, %cst_18 {dimension_numbers = #tpu.dot_dimension_numbers<[1], [0], [0], [1], [0, 0, 1, 1], [], []>} : vector<8x128xf32>, vector<128x128xf32>, vector<8x128xf32> -> vector<8x128xf32>
    %24 = arith.index_cast %c1_i32 : i32 to index
    %c0_19 = arith.constant 0 : index
    %c0_20 = arith.constant 0 : index
    %25 = vector.load %arg7[%24, %c0_19, %c0_20] : memref<8x8x128xf32, #tpu.memory_space<vmem>>, vector<1x8x128xf32>
    %26 = vector.shape_cast %25 : vector<1x8x128xf32> to vector<8x128xf32>
    %27 = arith.addf %23, %26 : vector<8x128xf32>
    %cst_21 = arith.constant 5.000000e-01 : f32
    %28 = vector.broadcast %cst_21 : f32 to vector<8x128xf32>
    %29 = arith.mulf %28, %27 : vector<8x128xf32>
    %30 = math.tanh %29 : vector<8x128xf32>
    %cst_22 = arith.constant 1.000000e+00 : f32
    %31 = vector.broadcast %cst_22 : f32 to vector<8x128xf32>
    %32 = arith.addf %30, %31 : vector<8x128xf32>
    %cst_23 = arith.constant 5.000000e-01 : f32
    %33 = vector.broadcast %cst_23 : f32 to vector<8x128xf32>
    %34 = arith.mulf %33, %32 : vector<8x128xf32>
    %c2_i32 = arith.constant 2 : i32
    %cst_24 = arith.constant dense<0.000000e+00> : vector<8x128xf32>
    %35 = tpu.matmul %34, %9, %cst_24 {dimension_numbers = #tpu.dot_dimension_numbers<[1], [0], [0], [1], [0, 0, 1, 1], [], []>} : vector<8x128xf32>, vector<128x128xf32>, vector<8x128xf32> -> vector<8x128xf32>
    %36 = arith.index_cast %c2_i32 : i32 to index
    %c0_25 = arith.constant 0 : index
    %c0_26 = arith.constant 0 : index
    %37 = vector.load %arg7[%36, %c0_25, %c0_26] : memref<8x8x128xf32, #tpu.memory_space<vmem>>, vector<1x8x128xf32>
    %38 = vector.shape_cast %37 : vector<1x8x128xf32> to vector<8x128xf32>
    %39 = arith.addf %35, %38 : vector<8x128xf32>
    %cst_27 = arith.constant 5.000000e-01 : f32
    %40 = vector.broadcast %cst_27 : f32 to vector<8x128xf32>
    %41 = arith.mulf %40, %39 : vector<8x128xf32>
    %42 = math.tanh %41 : vector<8x128xf32>
    %cst_28 = arith.constant 1.000000e+00 : f32
    %43 = vector.broadcast %cst_28 : f32 to vector<8x128xf32>
    %44 = arith.addf %42, %43 : vector<8x128xf32>
    %cst_29 = arith.constant 5.000000e-01 : f32
    %45 = vector.broadcast %cst_29 : f32 to vector<8x128xf32>
    %46 = arith.mulf %45, %44 : vector<8x128xf32>
    %c3_i32 = arith.constant 3 : i32
    %cst_30 = arith.constant dense<0.000000e+00> : vector<8x128xf32>
    %47 = tpu.matmul %46, %9, %cst_30 {dimension_numbers = #tpu.dot_dimension_numbers<[1], [0], [0], [1], [0, 0, 1, 1], [], []>} : vector<8x128xf32>, vector<128x128xf32>, vector<8x128xf32> -> vector<8x128xf32>
    %48 = arith.index_cast %c3_i32 : i32 to index
    %c0_31 = arith.constant 0 : index
    %c0_32 = arith.constant 0 : index
    %49 = vector.load %arg7[%48, %c0_31, %c0_32] : memref<8x8x128xf32, #tpu.memory_space<vmem>>, vector<1x8x128xf32>
    %50 = vector.shape_cast %49 : vector<1x8x128xf32> to vector<8x128xf32>
    %51 = arith.addf %47, %50 : vector<8x128xf32>
    %cst_33 = arith.constant 5.000000e-01 : f32
    %52 = vector.broadcast %cst_33 : f32 to vector<8x128xf32>
    %53 = arith.mulf %52, %51 : vector<8x128xf32>
    %54 = math.tanh %53 : vector<8x128xf32>
    %cst_34 = arith.constant 1.000000e+00 : f32
    %55 = vector.broadcast %cst_34 : f32 to vector<8x128xf32>
    %56 = arith.addf %54, %55 : vector<8x128xf32>
    %cst_35 = arith.constant 5.000000e-01 : f32
    %57 = vector.broadcast %cst_35 : f32 to vector<8x128xf32>
    %58 = arith.mulf %57, %56 : vector<8x128xf32>
    %c4_i32 = arith.constant 4 : i32
    %cst_36 = arith.constant dense<0.000000e+00> : vector<8x128xf32>
    %59 = tpu.matmul %58, %9, %cst_36 {dimension_numbers = #tpu.dot_dimension_numbers<[1], [0], [0], [1], [0, 0, 1, 1], [], []>} : vector<8x128xf32>, vector<128x128xf32>, vector<8x128xf32> -> vector<8x128xf32>
    %60 = arith.index_cast %c4_i32 : i32 to index
    %c0_37 = arith.constant 0 : index
    %c0_38 = arith.constant 0 : index
    %61 = vector.load %arg7[%60, %c0_37, %c0_38] : memref<8x8x128xf32, #tpu.memory_space<vmem>>, vector<1x8x128xf32>
    %62 = vector.shape_cast %61 : vector<1x8x128xf32> to vector<8x128xf32>
    %63 = arith.addf %59, %62 : vector<8x128xf32>
    %cst_39 = arith.constant 5.000000e-01 : f32
    %64 = vector.broadcast %cst_39 : f32 to vector<8x128xf32>
    %65 = arith.mulf %64, %63 : vector<8x128xf32>
    %66 = math.tanh %65 : vector<8x128xf32>
    %cst_40 = arith.constant 1.000000e+00 : f32
    %67 = vector.broadcast %cst_40 : f32 to vector<8x128xf32>
    %68 = arith.addf %66, %67 : vector<8x128xf32>
    %cst_41 = arith.constant 5.000000e-01 : f32
    %69 = vector.broadcast %cst_41 : f32 to vector<8x128xf32>
    %70 = arith.mulf %69, %68 : vector<8x128xf32>
    %c5_i32 = arith.constant 5 : i32
    %cst_42 = arith.constant dense<0.000000e+00> : vector<8x128xf32>
    %71 = tpu.matmul %70, %9, %cst_42 {dimension_numbers = #tpu.dot_dimension_numbers<[1], [0], [0], [1], [0, 0, 1, 1], [], []>} : vector<8x128xf32>, vector<128x128xf32>, vector<8x128xf32> -> vector<8x128xf32>
    %72 = arith.index_cast %c5_i32 : i32 to index
    %c0_43 = arith.constant 0 : index
    %c0_44 = arith.constant 0 : index
    %73 = vector.load %arg7[%72, %c0_43, %c0_44] : memref<8x8x128xf32, #tpu.memory_space<vmem>>, vector<1x8x128xf32>
    %74 = vector.shape_cast %73 : vector<1x8x128xf32> to vector<8x128xf32>
    %75 = arith.addf %71, %74 : vector<8x128xf32>
    %cst_45 = arith.constant 5.000000e-01 : f32
    %76 = vector.broadcast %cst_45 : f32 to vector<8x128xf32>
    %77 = arith.mulf %76, %75 : vector<8x128xf32>
    %78 = math.tanh %77 : vector<8x128xf32>
    %cst_46 = arith.constant 1.000000e+00 : f32
    %79 = vector.broadcast %cst_46 : f32 to vector<8x128xf32>
    %80 = arith.addf %78, %79 : vector<8x128xf32>
    %cst_47 = arith.constant 5.000000e-01 : f32
    %81 = vector.broadcast %cst_47 : f32 to vector<8x128xf32>
    %82 = arith.mulf %81, %80 : vector<8x128xf32>
    %c6_i32 = arith.constant 6 : i32
    %cst_48 = arith.constant dense<0.000000e+00> : vector<8x128xf32>
    %83 = tpu.matmul %82, %9, %cst_48 {dimension_numbers = #tpu.dot_dimension_numbers<[1], [0], [0], [1], [0, 0, 1, 1], [], []>} : vector<8x128xf32>, vector<128x128xf32>, vector<8x128xf32> -> vector<8x128xf32>
    %84 = arith.index_cast %c6_i32 : i32 to index
    %c0_49 = arith.constant 0 : index
    %c0_50 = arith.constant 0 : index
    %85 = vector.load %arg7[%84, %c0_49, %c0_50] : memref<8x8x128xf32, #tpu.memory_space<vmem>>, vector<1x8x128xf32>
    %86 = vector.shape_cast %85 : vector<1x8x128xf32> to vector<8x128xf32>
    %87 = arith.addf %83, %86 : vector<8x128xf32>
    %cst_51 = arith.constant 5.000000e-01 : f32
    %88 = vector.broadcast %cst_51 : f32 to vector<8x128xf32>
    %89 = arith.mulf %88, %87 : vector<8x128xf32>
    %90 = math.tanh %89 : vector<8x128xf32>
    %cst_52 = arith.constant 1.000000e+00 : f32
    %91 = vector.broadcast %cst_52 : f32 to vector<8x128xf32>
    %92 = arith.addf %90, %91 : vector<8x128xf32>
    %cst_53 = arith.constant 5.000000e-01 : f32
    %93 = vector.broadcast %cst_53 : f32 to vector<8x128xf32>
    %94 = arith.mulf %93, %92 : vector<8x128xf32>
    %c7_i32 = arith.constant 7 : i32
    %cst_54 = arith.constant dense<0.000000e+00> : vector<8x128xf32>
    %95 = tpu.matmul %94, %9, %cst_54 {dimension_numbers = #tpu.dot_dimension_numbers<[1], [0], [0], [1], [0, 0, 1, 1], [], []>} : vector<8x128xf32>, vector<128x128xf32>, vector<8x128xf32> -> vector<8x128xf32>
    %96 = arith.index_cast %c7_i32 : i32 to index
    %c0_55 = arith.constant 0 : index
    %c0_56 = arith.constant 0 : index
    %97 = vector.load %arg7[%96, %c0_55, %c0_56] : memref<8x8x128xf32, #tpu.memory_space<vmem>>, vector<1x8x128xf32>
    %98 = vector.shape_cast %97 : vector<1x8x128xf32> to vector<8x128xf32>
    %99 = arith.addf %95, %98 : vector<8x128xf32>
    %cst_57 = arith.constant 5.000000e-01 : f32
    %100 = vector.broadcast %cst_57 : f32 to vector<8x128xf32>
    %101 = arith.mulf %100, %99 : vector<8x128xf32>
    %102 = math.tanh %101 : vector<8x128xf32>
    %cst_58 = arith.constant 1.000000e+00 : f32
    %103 = vector.broadcast %cst_58 : f32 to vector<8x128xf32>
    %104 = arith.addf %102, %103 : vector<8x128xf32>
    %cst_59 = arith.constant 5.000000e-01 : f32
    %105 = vector.broadcast %cst_59 : f32 to vector<8x128xf32>
    %106 = arith.mulf %105, %104 : vector<8x128xf32>
    %c8_i32 = arith.constant 8 : i32
    %c0_60 = arith.constant 0 : index
    %c0_61 = arith.constant 0 : index
    %107 = vector.load %arg4[%c0_60, %c0_61] : memref<128x128xf32, #tpu.memory_space<vmem>>, vector<128x128xf32>
    %cst_62 = arith.constant dense<0.000000e+00> : vector<8x128xf32>
    %108 = tpu.matmul %106, %107, %cst_62 {dimension_numbers = #tpu.dot_dimension_numbers<[1], [0], [0], [1], [0, 0, 1, 1], [], []>} : vector<8x128xf32>, vector<128x128xf32>, vector<8x128xf32> -> vector<8x128xf32>
    %c0_63 = arith.constant 0 : index
    %c0_64 = arith.constant 0 : index
    %109 = vector.load %arg5[%c0_63, %c0_64] : memref<1x128xf32, #tpu.memory_space<vmem>>, vector<1x128xf32>
    %110 = vector.broadcast %109 : vector<1x128xf32> to vector<8x128xf32>
    %111 = arith.addf %108, %110 : vector<8x128xf32>
    %c0_65 = arith.constant 0 : index
    %c0_66 = arith.constant 0 : index
    %112 = vector.load %arg6[%c0_65, %c0_66] : memref<8x128xf32, #tpu.memory_space<vmem>>, vector<8x128xf32>
    tpu.vector_store %arg6[%c0_65, %c0_66], %111 {strides = array<i32>} : memref<8x128xf32, #tpu.memory_space<vmem>>, vector<8x128xf32>,
    return
  }
}

</mosaic_0001>

<bundles_post_ra>
// kernel: tpu_custom_call.1
= control target key start
LH: loop header
LB: loop body
LE: loop exit
PB: predicated region body
PF: predicated region fallthrough
CT: control target
= control target key end

     0   :  { %11 = vsyncpa [#allocation4], 0  ;;  %s2053_s0 = inlined_call_operand.hbm [shape: f32[8,8,128], index: 0, kind: input, shape index: {}]   ;;  %s2054_s1 = inlined_call_operand.hbm [shape: f32[128,128], index: 1, kind: input, shape index: {}]   ;;  %s2055_s2 = inlined_call_operand.hbm [shape: f32[128,128], index: 2, kind: input, shape index: {}]   ;;  %s2056_s3 = inlined_call_operand.vmem [shape: f32[1,128], index: 3, kind: input, shape index: {}]   ;;  %s2057_s4 = inlined_call_operand.hbm [shape: f32[128,128], index: 4, kind: input, shape index: {}]   ;;  %s2058_s5 = inlined_call_operand.vmem [shape: f32[1,128], index: 5, kind: input, shape index: {}]   ;;  %s2059_s6 = inlined_call_operand.hbm [shape: f32[8,128], index: 6, kind: output, shape index: {}]  }
   0x1   :  { %12 = vsyncpa [#allocation7], 0 }
   0x2   :  { %13 = vsyncpa [#allocation10], 0 }
   0x3   :  { %14 = vsyncpa [#allocation5], 0  ;;  %s1628_s21 = smov [#allocation6]   ;;  %s1629_s23 = smov [#allocation3]  }
   0x4   :  { %s32_s22 = sshll.u32 %s1628_s21, 4  ;;  %s20_s24 = sshll.u32 %s1629_s23, 4  ;;  %s33_s22 = int_to_ptr.vmem [resolvable:$true] %s32_s22  ;;  %s21_s24 = int_to_ptr.vmem [resolvable:$true] %s20_s24 }
   0x5   :  { %s1528_s25 = scalar_lea.vmem %s33_s22, 2048  ;;  %p1533_p1 = scmp.lt.s32.totalorder %s33_s22, %s33_s22 }
   0x6   :  { %p1529_p0 = scmp.ne.s32.totalorder %s33_s22, %s1528_s25  ;;  %p1534_p2 = scmp.lt.s32.totalorder %s1528_s25, %s1528_s25 }
   0x8   :  { %p1535_p3 = por %p1534_p2, %p1533_p1 }
   0xa   :  { %p1536_p4 = pnand %p1535_p3, %p1529_p0 }
   0xc   :  { %1539 = shalt.err (!%p1536_p4)
}
   0xd   :  { %s1630_s26 = smov 128   ;;  %s1631_s27 = smov 8  }
   0xe   :  { %38 = dma.hbm_to_vmem [thread:$0]  %s2054_s1, 2048, %s33_s22, [#allocation7], %s1630_s26, %s1630_s26, %s1631_s27  }
   0xf   :  { %s1548_s30 = scalar_lea.vmem %s21_s24, 1024  ;;  %p1553_p6 = scmp.lt.s32.totalorder %s21_s24, %s21_s24 }
  0x10   :  { %p1549_p5 = scmp.ne.s32.totalorder %s21_s24, %s1548_s30  ;;  %p1554_p7 = scmp.lt.s32.totalorder %s1548_s30, %s1548_s30 }
  0x12   :  { %p1555_p8 = por %p1554_p7, %p1553_p6 }
  0x14   :  { %p1556_p9 = pnand %p1555_p8, %p1549_p5 }
  0x16   :  { %1559 = shalt.err (!%p1556_p9)
}
  0x17   :  { %26 = dma.hbm_to_vmem [thread:$0]  %s2053_s0, 1024, %s21_s24, [#allocation4], %s1630_s26, %s1630_s26, %s1631_s27  }
  0x18   :  { %s1632_s9 = smov [#allocation8]   ;;  %s1633_s11 = smov [#allocation9]  }
  0x19   :  { %s44_s10 = sshll.u32 %s1632_s9, 4  ;;  %s58_s12 = sshll.u32 %s1633_s11, 4  ;;  %s45_s10 = int_to_ptr.vmem [resolvable:$true] %s44_s10  ;;  %s59_s12 = int_to_ptr.vmem [resolvable:$true] %s58_s12 }
  0x1a   :  { %s1568_s1 = scalar_lea.vmem %s45_s10, 2048  ;;  %p1573_p11 = scmp.lt.s32.totalorder %s45_s10, %s45_s10 }
  0x1b   :  { %p1569_p10 = scmp.ne.s32.totalorder %s45_s10, %s1568_s1  ;;  %p1574_p12 = scmp.lt.s32.totalorder %s1568_s1, %s1568_s1 }
  0x1d   :  { %p1575_p13 = por %p1574_p12, %p1573_p11 }
  0x1f   :  { %p1576_p0 = pnand %p1575_p13, %p1569_p10 }
  0x21   :  { %1579 = shalt.err (!%p1576_p0)
}
  0x22   :  { %50 = dma.hbm_to_vmem [thread:$0]  %s2055_s2, 2048, %s45_s10, [#allocation7], %s1630_s26, %s1630_s26, %s1631_s27  }
  0x23   :  { %s1588_s0 = scalar_lea.vmem %s59_s12, 2048  ;;  %p1593_p2 = scmp.lt.s32.totalorder %s59_s12, %s59_s12 }
  0x24   :  { %p1589_p1 = scmp.ne.s32.totalorder %s59_s12, %s1588_s0  ;;  %p1594_p3 = scmp.lt.s32.totalorder %s1588_s0, %s1588_s0 }
  0x26   :  { %p1595_p4 = por %p1594_p3, %p1593_p2 }
  0x28   :  { %p1596_p5 = pnand %p1595_p4, %p1589_p1 }
  0x2a   :  { %1599 = shalt.err (!%p1596_p5)
}
  0x2b   :  { %64 = dma.hbm_to_vmem [thread:$0]  %s2057_s4, 2048, %s59_s12, [#allocation10], %s1630_s26, %s1630_s26, %s1631_s27  }
  0x2c   :  { %1620 = dma.done.wait [#allocation4], 1024  }
  0x2d   :  { %1621 = vsyncadd [#allocation4], 4294966272 }
  0x2e   :  { %1622 = dma.done.wait [#allocation7], 4096  }
  0x2f   :  { %1623 = vsyncadd [#allocation7], 4294963200 }
  0x30   :  { %1624 = dma.done.wait [#allocation10], 2048  }
  0x31   :  { %1625 = vsyncadd [#allocation10], 4294965248  ;;  %v1634_v0 = vmov 0.0   ;;  %vm1635_vm0 = vmmov 0   ;;  %v102_v1 = vld [vmem:[#allocation8 + $0x78] sm:$0xff]  ;;  %v101_v2 = vld [vmem:[#allocation8 + $0x70] sm:$0xff] }
  0x32   :  { %1180 = vmatprep.subr.mxu1 %v1634_v0  ;;  %1212 = vmatprep.mubr.msk.f32.mxu1 %vm1635_vm0, %v1634_v0  ;;  %v1699_v3 = vld [vmem:[#allocation6 + $0x78] sm:$0xff]  ;;  %v1702_v4 = vld [vmem:[#allocation6 + $0x70] sm:$0xff]  ;;  %v100_v5 = vld [vmem:[#allocation8 + $0x68] sm:$0xff]  ;;  %s1636_s18 = smov [#allocation11]  }
  0x33   :  { %1136 = vmatprep.subr.mxu0 %v102_v1  ;;  %1181 = vmatpush3.msra.mxu1 %v1699_v3  ;;  %v1705_v6 = vld [vmem:[#allocation6 + $0x68] sm:$0xff]  ;;  %v99_v7 = vld [vmem:[#allocation8 + $0x60] sm:$0xff]  ;;  %v98_v9 = vld [vmem:[#allocation8 + $0x58] sm:$0xff]  ;;  %s946_s19 = sshll.u32 %s1636_s18, 4  ;;  %s947_s19 = int_to_ptr.vmem [resolvable:$true] %s946_s19 }
  0x34   :  { %1137 = vmatpush3.msra.mxu0 %v102_v1  ;;  %1182 = vmatprep.subr.mxu1 %v1634_v0  ;;  %v1709_v8 = vld [vmem:[#allocation6 + $0x60] sm:$0xff]  ;;  %v1713_v10 = vld [vmem:[#allocation6 + $0x58] sm:$0xff]  ;;  %v97_v11 = vld [vmem:[#allocation8 + $0x50] sm:$0xff]  ;;  %s1600_s20 = scalar_lea.vmem %s947_s19, 128  ;;  %p1605_p7 = scmp.lt.s32.totalorder %s947_s19, %s947_s19 }
  0x35   :  { %1138 = vmatprep.subr.mxu0 %v101_v2  ;;  %1183 = vmatpush3.msra.mxu1 %v1702_v4  ;;  %v1717_v12 = vld [vmem:[#allocation6 + $0x50] sm:$0xff]  ;;  %v96_v13 = vld [vmem:[#allocation8 + $0x48] sm:$0xff]  ;;  %v95_v15 = vld [vmem:[#allocation8 + $0x40] sm:$0xff]  ;;  %p1601_p6 = scmp.ne.s32.totalorder %s947_s19, %s1600_s20  ;;  %p1606_p8 = scmp.lt.s32.totalorder %s1600_s20, %s1600_s20 }
  0x36   :  { %1139 = vmatpush3.msra.mxu0 %v101_v2  ;;  %1184 = vmatprep.subr.mxu1 %v1634_v0  ;;  %v1721_v14 = vld [vmem:[#allocation6 + $0x48] sm:$0xff]  ;;  %v1725_v16 = vld [vmem:[#allocation6 + $0x40] sm:$0xff]  ;;  %v94_v17 = vld [vmem:[#allocation8 + $0x38] sm:$0xff] }
  0x37   :  { %1140 = vmatprep.subr.mxu0 %v100_v5  ;;  %1185 = vmatpush3.msra.mxu1 %v1705_v6  ;;  %v1729_v18 = vld [vmem:[#allocation6 + $0x38] sm:$0xff]  ;;  %v93_v19 = vld [vmem:[#allocation8 + $0x30] sm:$0xff]  ;;  %v92_v21 = vld [vmem:[#allocation8 + $0x28] sm:$0xff]  ;;  %p1607_p9 = por %p1606_p8, %p1605_p7 }
  0x38   :  { %1141 = vmatpush3.msra.mxu0 %v100_v5  ;;  %1186 = vmatprep.subr.mxu1 %v1634_v0  ;;  %v1733_v20 = vld [vmem:[#allocation6 + $0x30] sm:$0xff]  ;;  %v1737_v22 = vld [vmem:[#allocation6 + $0x28] sm:$0xff]  ;;  %v91_v23 = vld [vmem:[#allocation8 + $0x20] sm:$0xff] }
  0x39   :  { %1142 = vmatprep.subr.mxu0 %v99_v7  ;;  %1187 = vmatpush3.msra.mxu1 %v1709_v8  ;;  %v1741_v24 = vld [vmem:[#allocation6 + $0x20] sm:$0xff]  ;;  %v90_v25 = vld [vmem:[#allocation8 + $0x18] sm:$0xff]  ;;  %v89_v27 = vld [vmem:[#allocation8 + $0x10] sm:$0xff]  ;;  %p1608_p10 = pnand %p1607_p9, %p1601_p6 }
  0x3a   :  { %1143 = vmatpush3.msra.mxu0 %v99_v7  ;;  %1188 = vmatprep.subr.mxu1 %v1634_v0  ;;  %v1745_v26 = vld [vmem:[#allocation6 + $0x18] sm:$0xff]  ;;  %v1749_v28 = vld [vmem:[#allocation6 + $0x10] sm:$0xff]  ;;  %v88_v29 = vld [vmem:[#allocation8 + $0x8] sm:$0xff] }
  0x3b   :  { %1144 = vmatprep.subr.mxu0 %v98_v9  ;;  %1189 = vmatpush3.msra.mxu1 %v1713_v10  ;;  %v79_v30 = vld [vmem:[#allocation3] sm:$0xff]  ;;  %v1754_v31 = vld [vmem:[#allocation6 + $0x8] sm:$0xff]  ;;  %v81_v35 = vld [vmem:[#allocation3 + $0x10] sm:$0xff] }
  0x3c   :  { %1145 = vmatpush3.msra.mxu0 %v98_v9  ;;  %1190 = vmatprep.subr.mxu1 %v1634_v0  ;;  %v87_v32 = vld [vmem:[#allocation8] sm:$0xff]  ;;  %v80_v34 = vld [vmem:[#allocation3 + $0x8] sm:$0xff]  ;;  %v82_v36 = vld [vmem:[#allocation3 + $0x18] sm:$0xff] }
  0x3d   :  { %1146 = vmatprep.subr.mxu0 %v97_v11  ;;  %1191 = vmatpush3.msra.mxu1 %v1717_v12  ;;  %v1757_v33 = vld [vmem:[#allocation6] sm:$0xff]  ;;  %v84_v38 = vld [vmem:[#allocation3 + $0x28] sm:$0xff]  ;;  %v85_v39 = vld [vmem:[#allocation3 + $0x30] sm:$0xff] }
  0x3e   :  { %1147 = vmatpush3.msra.mxu0 %v97_v11  ;;  %1192 = vmatprep.subr.mxu1 %v1634_v0  ;;  %v83_v37 = vld [vmem:[#allocation3 + $0x20] sm:$0xff]  ;;  %v86_v40 = vld [vmem:[#allocation3 + $0x38] sm:$0xff] }
  0x3f   :  { %1148 = vmatprep.subr.mxu0 %v96_v13  ;;  %1193 = vmatpush3.msra.mxu1 %v1721_v14  ;;  %v1836_v43 = vld [vmem:[%s2056_s3] ss:$0 sm:$0xff] }
  0x40   :  { %1149 = vmatpush3.msra.mxu0 %v96_v13  ;;  %1194 = vmatprep.subr.mxu1 %v1634_v0 }
  0x41   :  { %1150 = vmatprep.subr.mxu0 %v95_v15  ;;  %1195 = vmatpush3.msra.mxu1 %v1725_v16 }
  0x42   :  { %1151 = vmatpush3.msra.mxu0 %v95_v15  ;;  %1196 = vmatprep.subr.mxu1 %v1634_v0 }
  0x43   :  { %1152 = vmatprep.subr.mxu0 %v94_v17  ;;  %1197 = vmatpush3.msra.mxu1 %v1729_v18 }
  0x44   :  { %1153 = vmatpush3.msra.mxu0 %v94_v17  ;;  %1198 = vmatprep.subr.mxu1 %v1634_v0 }
  0x45   :  { %1154 = vmatprep.subr.mxu0 %v93_v19  ;;  %1199 = vmatpush3.msra.mxu1 %v1733_v20 }
  0x46   :  { %1155 = vmatpush3.msra.mxu0 %v93_v19  ;;  %1200 = vmatprep.subr.mxu1 %v1634_v0 }
  0x47   :  { %1156 = vmatprep.subr.mxu0 %v92_v21  ;;  %1201 = vmatpush3.msra.mxu1 %v1737_v22 }
  0x48   :  { %1157 = vmatpush3.msra.mxu0 %v92_v21  ;;  %1202 = vmatprep.subr.mxu1 %v1634_v0 }
  0x49   :  { %1158 = vmatprep.subr.mxu0 %v91_v23  ;;  %1203 = vmatpush3.msra.mxu1 %v1741_v24 }
  0x4a   :  { %1159 = vmatpush3.msra.mxu0 %v91_v23  ;;  %1204 = vmatprep.subr.mxu1 %v1634_v0 }
  0x4b   :  { %1160 = vmatprep.subr.mxu0 %v90_v25  ;;  %1205 = vmatpush3.msra.mxu1 %v1745_v26 }
  0x4c   :  { %1161 = vmatpush3.msra.mxu0 %v90_v25  ;;  %1206 = vmatprep.subr.mxu1 %v1634_v0 }
  0x4d   :  { %1162 = vmatprep.subr.mxu0 %v89_v27  ;;  %1207 = vmatpush3.msra.mxu1 %v1749_v28 }
  0x4e   :  { %1163 = vmatpush3.msra.mxu0 %v89_v27  ;;  %1208 = vmatprep.subr.mxu1 %v1634_v0 }
  0x4f   :  { %1164 = vmatprep.subr.mxu0 %v88_v29  ;;  %1168 = vmatprep.mubr.f32.mxu0 %v79_v30 }
  0x50   :  { %1165 = vmatpush3.msra.mxu0 %v88_v29  ;;  %1209 = vmatpush3.msra.mxu1 %v1754_v31 }
  0x51   :  { %1166 = vmatprep.subr.mxu0 %v87_v32  ;;  %1210 = vmatprep.subr.mxu1 %v1634_v0 }
  0x52   :  { %1167 = vmatpush3.msra.mxu0 %v87_v32  ;;  %1211 = vmatpush3.msra.mxu1 %v1757_v33 }
  0x53   :  { %1169 = vmatmul.mubr.f32.vlgmr.msra.gmra.mxu0 %v80_v34  ;;  %1213 = vmatmul.mubr.f32.vlgmr.msra.gmra.mxu1 %v1634_v0 }
  0x54   :  { %1215 = vmatprep.subr.mxu0 %v1634_v0  ;;  %1250 = vmatprep.subr.mxu1 %v1634_v0 }
  0x55   :  { %1216 = vmatpush3.msra.mxu0 %v1699_v3  ;;  %1251 = vmatpush3.msra.mxu1 %v1699_v3 }
  0x56   :  { %1217 = vmatprep.subr.mxu0 %v1634_v0  ;;  %1252 = vmatprep.subr.mxu1 %v1634_v0 }
  0x57   :  { %1218 = vmatpush3.msra.mxu0 %v1702_v4  ;;  %1253 = vmatpush3.msra.mxu1 %v1702_v4 }
  0x58   :  { %1219 = vmatprep.subr.mxu0 %v1634_v0  ;;  %1254 = vmatprep.subr.mxu1 %v1634_v0 }
  0x59   :  { %1220 = vmatpush3.msra.mxu0 %v1705_v6  ;;  %1255 = vmatpush3.msra.mxu1 %v1705_v6 }
  0x5a   :  { %1221 = vmatprep.subr.mxu0 %v1634_v0  ;;  %1256 = vmatprep.subr.mxu1 %v1634_v0 }
  0x5b   :  { %1222 = vmatpush3.msra.mxu0 %v1709_v8  ;;  %1257 = vmatpush3.msra.mxu1 %v1709_v8 }
  0x5c   :  { %1223 = vmatprep.subr.mxu0 %v1634_v0  ;;  %1258 = vmatprep.subr.mxu1 %v1634_v0 }
  0x5d   :  { %1224 = vmatpush3.msra.mxu0 %v1713_v10  ;;  %1259 = vmatpush3.msra.mxu1 %v1713_v10 }
  0x5e   :  { %1225 = vmatprep.subr.mxu0 %v1634_v0  ;;  %1260 = vmatprep.subr.mxu1 %v1634_v0 }
  0x5f   :  { %1226 = vmatpush3.msra.mxu0 %v1717_v12  ;;  %1261 = vmatpush3.msra.mxu1 %v1717_v12 }
  0x60   :  { %1227 = vmatprep.subr.mxu0 %v1634_v0  ;;  %1262 = vmatprep.subr.mxu1 %v1634_v0 }
  0x61   :  { %1228 = vmatpush3.msra.mxu0 %v1721_v14  ;;  %1263 = vmatpush3.msra.mxu1 %v1721_v14 }
  0x62   :  { %1229 = vmatprep.subr.mxu0 %v1634_v0  ;;  %1264 = vmatprep.subr.mxu1 %v1634_v0 }
  0x63   :  { %1230 = vmatpush3.msra.mxu0 %v1725_v16  ;;  %1265 = vmatpush3.msra.mxu1 %v1725_v16 }
  0x64   :  { %1231 = vmatprep.subr.mxu0 %v1634_v0  ;;  %1266 = vmatprep.subr.mxu1 %v1634_v0 }
  0x65   :  { %1232 = vmatpush3.msra.mxu0 %v1729_v18  ;;  %1267 = vmatpush3.msra.mxu1 %v1729_v18 }
  0x66   :  { %1233 = vmatprep.subr.mxu0 %v1634_v0  ;;  %1268 = vmatprep.subr.mxu1 %v1634_v0 }
  0x67   :  { %1234 = vmatpush3.msra.mxu0 %v1733_v20  ;;  %1269 = vmatpush3.msra.mxu1 %v1733_v20 }
  0x68   :  { %1235 = vmatprep.subr.mxu0 %v1634_v0  ;;  %1270 = vmatprep.subr.mxu1 %v1634_v0 }
  0x69   :  { %1236 = vmatpush3.msra.mxu0 %v1737_v22  ;;  %1271 = vmatpush3.msra.mxu1 %v1737_v22 }
  0x6a   :  { %1237 = vmatprep.subr.mxu0 %v1634_v0  ;;  %1272 = vmatprep.subr.mxu1 %v1634_v0 }
  0x6b   :  { %1238 = vmatpush3.msra.mxu0 %v1741_v24  ;;  %1273 = vmatpush3.msra.mxu1 %v1741_v24 }
  0x6c   :  { %1239 = vmatprep.subr.mxu0 %v1634_v0  ;;  %1274 = vmatprep.subr.mxu1 %v1634_v0 }
  0x6d   :  { %1240 = vmatpush3.msra.mxu0 %v1745_v26  ;;  %1275 = vmatpush3.msra.mxu1 %v1745_v26 }
  0x6e   :  { %1241 = vmatprep.subr.mxu0 %v1634_v0  ;;  %1276 = vmatprep.subr.mxu1 %v1634_v0 }
  0x6f   :  { %1242 = vmatpush3.msra.mxu0 %v1749_v28  ;;  %1277 = vmatpush3.msra.mxu1 %v1749_v28 }
  0x70   :  { %1243 = vmatprep.subr.mxu0 %v1634_v0  ;;  %1278 = vmatprep.subr.mxu1 %v1634_v0 }
  0x71   :  { %1244 = vmatpush3.msra.mxu0 %v1754_v31  ;;  %1279 = vmatpush3.msra.mxu1 %v1754_v31 }
  0x72   :  { %1245 = vmatprep.subr.mxu0 %v1634_v0  ;;  %1280 = vmatprep.subr.mxu1 %v1634_v0 }
  0x73   :  { %1246 = vmatpush3.msra.mxu0 %v1757_v33  ;;  %1281 = vmatpush3.msra.mxu1 %v1757_v33 }
  0x74   :  { %1282 = vmatprep.mubr.msk.f32.mxu1 %vm1635_vm0, %v1634_v0  ;;  %1285 = vmatprep.subr.mxu0 %v1634_v0 }
  0x75   :  { %1320 = vmatprep.subr.mxu1 %v1634_v0  ;;  %1171 = vmatprep.mubr.f32.mxu0 %v81_v35 }
  0x76   :  { %1172 = vmatmul.mubr.f32.gmra.mxu0 %v82_v36 }
  0x77   :  { %1174 = vmatprep.mubr.f32.mxu0 %v83_v37 }
  0x7a   :  { %1175 = vmatmul.mubr.f32.gmra.mxu0 %v84_v38 }
  0x7b   :  { %1177 = vmatprep.mubr.f32.mxu0 %v85_v39 }
  0x7e   :  { %1178 = vmatmul.mubr.f32.gmra.mxu0 %v86_v40 }
  0x7f   :  { %1247 = vmatprep.mubr.msk.f32.mxu0 %vm1635_vm0, %v1634_v0 }
 0x113   :  { %v1170_v41 = vpop.f32.mrf.mxu0  ;;  %v306_v42 = vpop.f32.mrf.mxu1 }
 0x114   :  { %v182_v58 = vadd.f32 %v1170_v41, %v1836_v43 }
 0x115   :  { %v176_v44 = vpop.f32.mrf.mxu0  ;;  %v1214_v45 = vpop.f32.mrf.mxu1 }
 0x116   :  { %v177_v46 = vadd.f32 %v1836_v43, %v176_v44 }
 0x118   :  { %v307_v47 = vadd.f32 %v306_v42, %v177_v46 }
 0x11a   :  { %v310_v48 = vmul.f32 0.5, %v307_v47 }
 0x11c   :  { %1504 = vtanh.f32 %v310_v48  ;;  %v857_v48 = vld [vmem:[#allocation9 + $0x58] sm:$0xff] }
 0x129   :  { %v1505_v49 = vpop.eup %1504 }
 0x12a   :  { %v312_v50 = vadd.f32 1.0, %v1505_v49  ;;  %v856_v49 = vld [vmem:[#allocation9 + $0x50] sm:$0xff] }
 0x12c   :  { %v313_v51 = vmul.f32 0.5, %v312_v50  ;;  %v855_v50 = vld [vmem:[#allocation9 + $0x48] sm:$0xff] }
 0x12e   :  { %1248 = vmatmul.mubr.f32.vlgmr.msra.gmra.mxu0 %v313_v51  ;;  %v854_v51 = vld [vmem:[#allocation9 + $0x40] sm:$0xff] }
 0x12f   :  { %1286 = vmatpush3.msra.mxu0 %v1699_v3  ;;  %1317 = vmatprep.mubr.msk.f32.mxu0 %vm1635_vm0, %v1634_v0 }
 0x130   :  { %1287 = vmatprep.subr.mxu0 %v1634_v0 }
 0x131   :  { %1288 = vmatpush3.msra.mxu0 %v1702_v4 }
 0x132   :  { %1289 = vmatprep.subr.mxu0 %v1634_v0 }
 0x133   :  { %1290 = vmatpush3.msra.mxu0 %v1705_v6 }
 0x134   :  { %1291 = vmatprep.subr.mxu0 %v1634_v0 }
 0x135   :  { %1292 = vmatpush3.msra.mxu0 %v1709_v8 }
 0x136   :  { %1293 = vmatprep.subr.mxu0 %v1634_v0  ;;  %v1873_v52 = vpop.f32.mrf.mxu0 }
 0x137   :  { %1294 = vmatpush3.msra.mxu0 %v1713_v10  ;;  %v192_v21 = vadd.f32 %v1873_v52, %v1836_v43  ;;  %v853_v52 = vld [vmem:[#allocation9 + $0x38] sm:$0xff] }
 0x138   :  { %1295 = vmatprep.subr.mxu0 %v1634_v0  ;;  %v186_v53 = vpop.f32.mrf.mxu0 }
 0x139   :  { %1296 = vmatpush3.msra.mxu0 %v1717_v12  ;;  %v187_v5 = vadd.f32 %v1836_v43, %v186_v53  ;;  %v852_v53 = vld [vmem:[#allocation9 + $0x30] sm:$0xff] }
 0x13a   :  { %1297 = vmatprep.subr.mxu0 %v1634_v0  ;;  %v1875_v54 = vpop.f32.mrf.mxu0 }
 0x13b   :  { %1298 = vmatpush3.msra.mxu0 %v1721_v14 }
 0x13c   :  { %1299 = vmatprep.subr.mxu0 %v1634_v0  ;;  %v1877_v55 = vpop.f32.mrf.mxu0 }
 0x13d   :  { %1300 = vmatpush3.msra.mxu0 %v1725_v16  ;;  %v197_v35 = vadd.f32 %v1836_v43, %v1877_v55  ;;  %v850_v55 = vld [vmem:[#allocation9 + $0x20] sm:$0xff] }
 0x13e   :  { %1301 = vmatprep.subr.mxu0 %v1634_v0  ;;  %v1879_v56 = vpop.f32.mrf.mxu0 }
 0x13f   :  { %1302 = vmatpush3.msra.mxu0 %v1729_v18 }
 0x140   :  { %1303 = vmatprep.subr.mxu0 %v1634_v0  ;;  %v1881_v57 = vpop.f32.mrf.mxu0 }
 0x141   :  { %1304 = vmatpush3.msra.mxu0 %v1733_v20 }
 0x142   :  { %1305 = vmatprep.subr.mxu0 %v1634_v0 }
 0x143   :  { %1306 = vmatpush3.msra.mxu0 %v1737_v22 }
 0x144   :  { %1307 = vmatprep.subr.mxu0 %v1634_v0 }
 0x145   :  { %1308 = vmatpush3.msra.mxu0 %v1741_v24 }
 0x146   :  { %1309 = vmatprep.subr.mxu0 %v1634_v0 }
 0x147   :  { %1310 = vmatpush3.msra.mxu0 %v1745_v26 }
 0x148   :  { %1311 = vmatprep.subr.mxu0 %v1634_v0 }
 0x149   :  { %1312 = vmatpush3.msra.mxu0 %v1749_v28 }
 0x14a   :  { %1313 = vmatprep.subr.mxu0 %v1634_v0 }
 0x14b   :  { %1314 = vmatpush3.msra.mxu0 %v1754_v31 }
 0x14c   :  { %1315 = vmatprep.subr.mxu0 %v1634_v0 }
 0x14d   :  { %1316 = vmatpush3.msra.mxu0 %v1757_v33 }
 0x14e   :  { %1355 = vmatprep.subr.mxu0 %v1634_v0 }
 0x1ee   :  { %v382_v59 = vpop.f32.mrf.mxu0 }
 0x1ef   :  { %v383_v60 = vadd.f32 %v382_v59, %v182_v58  ;;  %v848_v58 = vld [vmem:[#allocation9 + $0x10] sm:$0xff]  ;;  %v847_v59 = vld [vmem:[#allocation9 + $0x8] sm:$0xff] }
 0x1f0   :  { %v1249_v61 = vpop.f32.mrf.mxu0 }
 0x1f1   :  { %v386_v62 = vmul.f32 0.5, %v383_v60  ;;  %v846_v60 = vld [vmem:[#allocation9] sm:$0xff]  ;;  %v212_v61 = vadd.f32 %v1879_v56, %v1836_v43 }
 0x1f3   :  { %1506 = vtanh.f32 %v386_v62 }
 0x200   :  { %v1507_v63 = vpop.eup %1506 }
 0x201   :  { %v388_v1 = vadd.f32 1.0, %v1507_v63 }
 0x203   :  { %v389_v2 = vmul.f32 0.5, %v388_v1 }
 0x205   :  { %1283 = vmatmul.mubr.f32.vlgmr.msra.gmra.mxu1 %v389_v2 }
 0x206   :  { %1321 = vmatpush3.msra.mxu1 %v1699_v3  ;;  %1352 = vmatprep.mubr.msk.f32.mxu1 %vm1635_vm0, %v1634_v0 }
 0x207   :  { %1322 = vmatprep.subr.mxu1 %v1634_v0 }
 0x208   :  { %1323 = vmatpush3.msra.mxu1 %v1702_v4 }
 0x209   :  { %1324 = vmatprep.subr.mxu1 %v1634_v0 }
 0x20a   :  { %1325 = vmatpush3.msra.mxu1 %v1705_v6 }
 0x20b   :  { %1326 = vmatprep.subr.mxu1 %v1634_v0 }
 0x20c   :  { %1327 = vmatpush3.msra.mxu1 %v1709_v8 }
 0x20d   :  { %1328 = vmatprep.subr.mxu1 %v1634_v0 }
 0x20e   :  { %1329 = vmatpush3.msra.mxu1 %v1713_v10 }
 0x20f   :  { %1330 = vmatprep.subr.mxu1 %v1634_v0 }
 0x210   :  { %1331 = vmatpush3.msra.mxu1 %v1717_v12 }
 0x211   :  { %1332 = vmatprep.subr.mxu1 %v1634_v0 }
 0x212   :  { %1333 = vmatpush3.msra.mxu1 %v1721_v14 }
 0x213   :  { %1334 = vmatprep.subr.mxu1 %v1634_v0 }
 0x214   :  { %1335 = vmatpush3.msra.mxu1 %v1725_v16 }
 0x215   :  { %1336 = vmatprep.subr.mxu1 %v1634_v0 }
 0x216   :  { %1337 = vmatpush3.msra.mxu1 %v1729_v18 }
 0x217   :  { %1338 = vmatprep.subr.mxu1 %v1634_v0 }
 0x218   :  { %1339 = vmatpush3.msra.mxu1 %v1733_v20 }
 0x219   :  { %1340 = vmatprep.subr.mxu1 %v1634_v0 }
 0x21a   :  { %1341 = vmatpush3.msra.mxu1 %v1737_v22 }
 0x21b   :  { %1342 = vmatprep.subr.mxu1 %v1634_v0 }
 0x21c   :  { %1343 = vmatpush3.msra.mxu1 %v1741_v24 }
 0x21d   :  { %1344 = vmatprep.subr.mxu1 %v1634_v0 }
 0x21e   :  { %1345 = vmatpush3.msra.mxu1 %v1745_v26 }
 0x21f   :  { %1346 = vmatprep.subr.mxu1 %v1634_v0 }
 0x220   :  { %1347 = vmatpush3.msra.mxu1 %v1749_v28 }
 0x221   :  { %1348 = vmatprep.subr.mxu1 %v1634_v0 }
 0x222   :  { %1349 = vmatpush3.msra.mxu1 %v1754_v31 }
 0x223   :  { %1350 = vmatprep.subr.mxu1 %v1634_v0 }
 0x224   :  { %1351 = vmatpush3.msra.mxu1 %v1757_v33 }
 0x225   :  { %1390 = vmatprep.subr.mxu1 %v1634_v0 }
 0x2c5   :  { %v458_v7 = vpop.f32.mrf.mxu1 }
 0x2c6   :  { %v459_v9 = vadd.f32 %v458_v7, %v187_v5 }
 0x2c7   :  { %v1284_v11 = vpop.f32.mrf.mxu1 }
 0x2c8   :  { %v462_v13 = vmul.f32 0.5, %v459_v9  ;;  %v958_v11 = vld [vmem:[%s2058_s5] ss:$0 sm:$0xff] }
 0x2ca   :  { %1508 = vtanh.f32 %v462_v13 }
 0x2d7   :  { %v1509_v15 = vpop.eup %1508 }
 0x2d8   :  { %v464_v17 = vadd.f32 1.0, %v1509_v15 }
 0x2da   :  { %v465_v19 = vmul.f32 0.5, %v464_v17 }
 0x2dc   :  { %1318 = vmatmul.mubr.f32.vlgmr.msra.gmra.mxu0 %v465_v19 }
 0x2dd   :  { %1356 = vmatpush3.msra.mxu0 %v1699_v3  ;;  %1387 = vmatprep.mubr.msk.f32.mxu0 %vm1635_vm0, %v1634_v0 }
 0x2de   :  { %1357 = vmatprep.subr.mxu0 %v1634_v0 }
 0x2df   :  { %1358 = vmatpush3.msra.mxu0 %v1702_v4 }
 0x2e0   :  { %1359 = vmatprep.subr.mxu0 %v1634_v0 }
 0x2e1   :  { %1360 = vmatpush3.msra.mxu0 %v1705_v6 }
 0x2e2   :  { %1361 = vmatprep.subr.mxu0 %v1634_v0 }
 0x2e3   :  { %1362 = vmatpush3.msra.mxu0 %v1709_v8 }
 0x2e4   :  { %1363 = vmatprep.subr.mxu0 %v1634_v0 }
 0x2e5   :  { %1364 = vmatpush3.msra.mxu0 %v1713_v10 }
 0x2e6   :  { %1365 = vmatprep.subr.mxu0 %v1634_v0 }
 0x2e7   :  { %1366 = vmatpush3.msra.mxu0 %v1717_v12 }
 0x2e8   :  { %1367 = vmatprep.subr.mxu0 %v1634_v0 }
 0x2e9   :  { %1368 = vmatpush3.msra.mxu0 %v1721_v14 }
 0x2ea   :  { %1369 = vmatprep.subr.mxu0 %v1634_v0 }
 0x2eb   :  { %1370 = vmatpush3.msra.mxu0 %v1725_v16 }
 0x2ec   :  { %1371 = vmatprep.subr.mxu0 %v1634_v0 }
 0x2ed   :  { %1372 = vmatpush3.msra.mxu0 %v1729_v18 }
 0x2ee   :  { %1373 = vmatprep.subr.mxu0 %v1634_v0 }
 0x2ef   :  { %1374 = vmatpush3.msra.mxu0 %v1733_v20 }
 0x2f0   :  { %1375 = vmatprep.subr.mxu0 %v1634_v0 }
 0x2f1   :  { %1376 = vmatpush3.msra.mxu0 %v1737_v22 }
 0x2f2   :  { %1377 = vmatprep.subr.mxu0 %v1634_v0 }
 0x2f3   :  { %1378 = vmatpush3.msra.mxu0 %v1741_v24 }
 0x2f4   :  { %1379 = vmatprep.subr.mxu0 %v1634_v0 }
 0x2f5   :  { %1380 = vmatpush3.msra.mxu0 %v1745_v26 }
 0x2f6   :  { %1381 = vmatprep.subr.mxu0 %v1634_v0 }
 0x2f7   :  { %1382 = vmatpush3.msra.mxu0 %v1749_v28 }
 0x2f8   :  { %1383 = vmatprep.subr.mxu0 %v1634_v0 }
 0x2f9   :  { %1384 = vmatpush3.msra.mxu0 %v1754_v31 }
 0x2fa   :  { %1385 = vmatprep.subr.mxu0 %v1634_v0 }
 0x2fb   :  { %1386 = vmatpush3.msra.mxu0 %v1757_v33 }
 0x2fc   :  { %1425 = vmatprep.subr.mxu0 %v1634_v0 }
 0x39c   :  { %v534_v23 = vpop.f32.mrf.mxu0 }
 0x39d   :  { %v535_v25 = vadd.f32 %v534_v23, %v192_v21 }
 0x39e   :  { %v1319_v27 = vpop.f32.mrf.mxu0 }
 0x39f   :  { %v538_v29 = vmul.f32 0.5, %v535_v25 }
 0x3a1   :  { %1510 = vtanh.f32 %v538_v29 }
 0x3ae   :  { %v1511_v30 = vpop.eup %1510 }
 0x3af   :  { %v540_v32 = vadd.f32 1.0, %v1511_v30 }
 0x3b1   :  { %v541_v34 = vmul.f32 0.5, %v540_v32 }
 0x3b3   :  { %1353 = vmatmul.mubr.f32.vlgmr.msra.gmra.mxu1 %v541_v34 }
 0x3b4   :  { %1391 = vmatpush3.msra.mxu1 %v1699_v3  ;;  %1422 = vmatprep.mubr.msk.f32.mxu1 %vm1635_vm0, %v1634_v0 }
 0x3b5   :  { %1392 = vmatprep.subr.mxu1 %v1634_v0 }
 0x3b6   :  { %1393 = vmatpush3.msra.mxu1 %v1702_v4 }
 0x3b7   :  { %1394 = vmatprep.subr.mxu1 %v1634_v0 }
 0x3b8   :  { %1395 = vmatpush3.msra.mxu1 %v1705_v6 }
 0x3b9   :  { %1396 = vmatprep.subr.mxu1 %v1634_v0 }
 0x3ba   :  { %1397 = vmatpush3.msra.mxu1 %v1709_v8 }
 0x3bb   :  { %1398 = vmatprep.subr.mxu1 %v1634_v0 }
 0x3bc   :  { %1399 = vmatpush3.msra.mxu1 %v1713_v10 }
 0x3bd   :  { %1400 = vmatprep.subr.mxu1 %v1634_v0 }
 0x3be   :  { %1401 = vmatpush3.msra.mxu1 %v1717_v12 }
 0x3bf   :  { %1402 = vmatprep.subr.mxu1 %v1634_v0 }
 0x3c0   :  { %1403 = vmatpush3.msra.mxu1 %v1721_v14 }
 0x3c1   :  { %1404 = vmatprep.subr.mxu1 %v1634_v0 }
 0x3c2   :  { %1405 = vmatpush3.msra.mxu1 %v1725_v16 }
 0x3c3   :  { %1406 = vmatprep.subr.mxu1 %v1634_v0 }
 0x3c4   :  { %1407 = vmatpush3.msra.mxu1 %v1729_v18 }
 0x3c5   :  { %1408 = vmatprep.subr.mxu1 %v1634_v0 }
 0x3c6   :  { %1409 = vmatpush3.msra.mxu1 %v1733_v20 }
 0x3c7   :  { %1410 = vmatprep.subr.mxu1 %v1634_v0 }
 0x3c8   :  { %1411 = vmatpush3.msra.mxu1 %v1737_v22 }
 0x3c9   :  { %1412 = vmatprep.subr.mxu1 %v1634_v0 }
 0x3ca   :  { %1413 = vmatpush3.msra.mxu1 %v1741_v24 }
 0x3cb   :  { %1414 = vmatprep.subr.mxu1 %v1634_v0 }
 0x3cc   :  { %1415 = vmatpush3.msra.mxu1 %v1745_v26 }
 0x3cd   :  { %1416 = vmatprep.subr.mxu1 %v1634_v0 }
 0x3ce   :  { %1417 = vmatpush3.msra.mxu1 %v1749_v28 }
 0x3cf   :  { %1418 = vmatprep.subr.mxu1 %v1634_v0 }
 0x3d0   :  { %1419 = vmatpush3.msra.mxu1 %v1754_v31 }
 0x3d1   :  { %1420 = vmatprep.subr.mxu1 %v1634_v0 }
 0x3d2   :  { %1421 = vmatpush3.msra.mxu1 %v1757_v33 }
 0x3d3   :  { %1460 = vmatprep.subr.mxu1 %v1634_v0 }
 0x473   :  { %v610_v36 = vpop.f32.mrf.mxu1 }
 0x474   :  { %v611_v37 = vadd.f32 %v610_v36, %v197_v35 }
 0x475   :  { %v1354_v38 = vpop.f32.mrf.mxu1 }
 0x476   :  { %v614_v39 = vmul.f32 0.5, %v611_v37 }
 0x478   :  { %1512 = vtanh.f32 %v614_v39 }
 0x485   :  { %v1513_v40 = vpop.eup %1512 }
 0x486   :  { %v616_v41 = vadd.f32 1.0, %v1513_v40 }
 0x488   :  { %v617_v42 = vmul.f32 0.5, %v616_v41 }
 0x48a   :  { %1388 = vmatmul.mubr.f32.vlgmr.msra.gmra.mxu0 %v617_v42 }
 0x48b   :  { %1426 = vmatpush3.msra.mxu0 %v1699_v3  ;;  %1457 = vmatprep.mubr.msk.f32.mxu0 %vm1635_vm0, %v1634_v0  ;;  %v202_v3 = vadd.f32 %v1875_v54, %v1836_v43  ;;  %v851_v54 = vld [vmem:[#allocation9 + $0x28] sm:$0xff] }
 0x48c   :  { %1427 = vmatprep.subr.mxu0 %v1634_v0 }
 0x48d   :  { %1428 = vmatpush3.msra.mxu0 %v1702_v4 }
 0x48e   :  { %1429 = vmatprep.subr.mxu0 %v1634_v0 }
 0x48f   :  { %1430 = vmatpush3.msra.mxu0 %v1705_v6 }
 0x490   :  { %1431 = vmatprep.subr.mxu0 %v1634_v0 }
 0x491   :  { %1432 = vmatpush3.msra.mxu0 %v1709_v8 }
 0x492   :  { %1433 = vmatprep.subr.mxu0 %v1634_v0 }
 0x493   :  { %1434 = vmatpush3.msra.mxu0 %v1713_v10 }
 0x494   :  { %1435 = vmatprep.subr.mxu0 %v1634_v0 }
 0x495   :  { %1436 = vmatpush3.msra.mxu0 %v1717_v12 }
 0x496   :  { %1437 = vmatprep.subr.mxu0 %v1634_v0 }
 0x497   :  { %1438 = vmatpush3.msra.mxu0 %v1721_v14 }
 0x498   :  { %1439 = vmatprep.subr.mxu0 %v1634_v0 }
 0x499   :  { %1440 = vmatpush3.msra.mxu0 %v1725_v16 }
 0x49a   :  { %1441 = vmatprep.subr.mxu0 %v1634_v0 }
 0x49b   :  { %1442 = vmatpush3.msra.mxu0 %v1729_v18  ;;  %v861_v18 = vld [vmem:[#allocation9 + $0x78] sm:$0xff] }
 0x49c   :  { %1443 = vmatprep.subr.mxu0 %v1634_v0 }
 0x49d   :  { %1444 = vmatpush3.msra.mxu0 %v1733_v20  ;;  %v860_v20 = vld [vmem:[#allocation9 + $0x70] sm:$0xff] }
 0x49e   :  { %1445 = vmatprep.subr.mxu0 %v1634_v0 }
 0x49f   :  { %1446 = vmatpush3.msra.mxu0 %v1737_v22  ;;  %v859_v22 = vld [vmem:[#allocation9 + $0x68] sm:$0xff] }
 0x4a0   :  { %1447 = vmatprep.subr.mxu0 %v1634_v0 }
 0x4a1   :  { %1448 = vmatpush3.msra.mxu0 %v1741_v24  ;;  %v858_v24 = vld [vmem:[#allocation9 + $0x60] sm:$0xff] }
 0x4a2   :  { %1449 = vmatprep.subr.mxu0 %v1634_v0 }
 0x4a3   :  { %1450 = vmatpush3.msra.mxu0 %v1745_v26  ;;  %v207_v26 = vadd.f32 %v1836_v43, %v1881_v57  ;;  %v849_v57 = vld [vmem:[#allocation9 + $0x18] sm:$0xff] }
 0x4a4   :  { %1451 = vmatprep.subr.mxu0 %v1634_v0 }
 0x4a5   :  { %1452 = vmatpush3.msra.mxu0 %v1749_v28 }
 0x4a6   :  { %1453 = vmatprep.subr.mxu0 %v1634_v0 }
 0x4a7   :  { %1454 = vmatpush3.msra.mxu0 %v1754_v31 }
 0x4a8   :  { %1455 = vmatprep.subr.mxu0 %v1634_v0 }
 0x4a9   :  { %1456 = vmatpush3.msra.mxu0 %v1757_v33 }
 0x54a   :  { %v686_v4 = vpop.f32.mrf.mxu0 }
 0x54b   :  { %v687_v6 = vadd.f32 %v686_v4, %v202_v3 }
 0x54c   :  { %v1389_v8 = vpop.f32.mrf.mxu0 }
 0x54d   :  { %v690_v10 = vmul.f32 0.5, %v687_v6 }
 0x54f   :  { %1514 = vtanh.f32 %v690_v10 }
 0x55c   :  { %v1515_v12 = vpop.eup %1514 }
 0x55d   :  { %v692_v14 = vadd.f32 1.0, %v1515_v12 }
 0x55f   :  { %v693_v16 = vmul.f32 0.5, %v692_v14 }
 0x561   :  { %1423 = vmatmul.mubr.f32.vlgmr.msra.gmra.mxu1 %v693_v16 }
 0x562   :  { %1492 = vmatprep.mubr.msk.f32.mxu1 %vm1635_vm0, %v1634_v0  ;;  %1461 = vmatpush3.msra.mxu1 %v861_v18 }
 0x563   :  { %1462 = vmatprep.subr.mxu1 %v1634_v0 }
 0x564   :  { %1463 = vmatpush3.msra.mxu1 %v860_v20 }
 0x565   :  { %1464 = vmatprep.subr.mxu1 %v1634_v0 }
 0x566   :  { %1465 = vmatpush3.msra.mxu1 %v859_v22 }
 0x567   :  { %1466 = vmatprep.subr.mxu1 %v1634_v0 }
 0x568   :  { %1467 = vmatpush3.msra.mxu1 %v858_v24 }
 0x569   :  { %1468 = vmatprep.subr.mxu1 %v1634_v0 }
 0x56a   :  { %1469 = vmatpush3.msra.mxu1 %v857_v48 }
 0x56b   :  { %1470 = vmatprep.subr.mxu1 %v1634_v0 }
 0x56c   :  { %1471 = vmatpush3.msra.mxu1 %v856_v49 }
 0x56d   :  { %1472 = vmatprep.subr.mxu1 %v1634_v0 }
 0x56e   :  { %1473 = vmatpush3.msra.mxu1 %v855_v50 }
 0x56f   :  { %1474 = vmatprep.subr.mxu1 %v1634_v0 }
 0x570   :  { %1475 = vmatpush3.msra.mxu1 %v854_v51 }
 0x571   :  { %1476 = vmatprep.subr.mxu1 %v1634_v0 }
 0x572   :  { %1477 = vmatpush3.msra.mxu1 %v853_v52 }
 0x573   :  { %1478 = vmatprep.subr.mxu1 %v1634_v0 }
 0x574   :  { %1479 = vmatpush3.msra.mxu1 %v852_v53 }
 0x575   :  { %1480 = vmatprep.subr.mxu1 %v1634_v0 }
 0x576   :  { %1481 = vmatpush3.msra.mxu1 %v851_v54 }
 0x577   :  { %1482 = vmatprep.subr.mxu1 %v1634_v0 }
 0x578   :  { %1483 = vmatpush3.msra.mxu1 %v850_v55 }
 0x579   :  { %1484 = vmatprep.subr.mxu1 %v1634_v0 }
 0x57a   :  { %1485 = vmatpush3.msra.mxu1 %v849_v57 }
 0x57b   :  { %1486 = vmatprep.subr.mxu1 %v1634_v0 }
 0x57c   :  { %1487 = vmatpush3.msra.mxu1 %v848_v58 }
 0x57d   :  { %1488 = vmatprep.subr.mxu1 %v1634_v0 }
 0x57e   :  { %1489 = vmatpush3.msra.mxu1 %v847_v59 }
 0x57f   :  { %1490 = vmatprep.subr.mxu1 %v1634_v0 }
 0x580   :  { %1491 = vmatpush3.msra.mxu1 %v846_v60 }
 0x621   :  { %v762_v28 = vpop.f32.mrf.mxu1 }
 0x622   :  { %v763_v31 = vadd.f32 %v762_v28, %v207_v26 }
 0x623   :  { %v1424_v33 = vpop.f32.mrf.mxu1 }
 0x624   :  { %v766_v44 = vmul.f32 0.5, %v763_v31 }
 0x626   :  { %1516 = vtanh.f32 %v766_v44 }
 0x633   :  { %v1517_v45 = vpop.eup %1516 }
 0x634   :  { %v768_v46 = vadd.f32 1.0, %v1517_v45 }
 0x636   :  { %v769_v47 = vmul.f32 0.5, %v768_v46 }
 0x638   :  { %1458 = vmatmul.mubr.f32.vlgmr.msra.gmra.mxu0 %v769_v47 }
 0x6f8   :  { %v838_v62 = vpop.f32.mrf.mxu0 }
 0x6f9   :  { %v839_v63 = vadd.f32 %v838_v62, %v212_v61 }
 0x6fa   :  { %v1459_v1 = vpop.f32.mrf.mxu0 }
 0x6fb   :  { %v842_v2 = vmul.f32 0.5, %v839_v63 }
 0x6fd   :  { %1518 = vtanh.f32 %v842_v2 }
 0x70a   :  { %v1519_v5 = vpop.eup %1518 }
 0x70b   :  { %v844_v7 = vadd.f32 1.0, %v1519_v5 }
 0x70d   :  { %v845_v9 = vmul.f32 0.5, %v844_v7 }
 0x70f   :  { %1493 = vmatmul.mubr.f32.vlgmr.msra.gmra.mxu1 %v845_v9 }
 0x7cf   :  { %v935_v0 = vpop.f32.mrf.mxu1 }
 0x7d0   :  { %v936_v13 = vadd.f32 %v958_v11, %v935_v0 }
 0x7d1   :  { %v1494_v15 = vpop.f32.mrf.mxu1 }
 0x7d2   :  { %939 = vst [vmem:[#allocation11] sm:$0xff] %v936_v13 }
 0x7d3   :  { %1611 = shalt.err (!%p1608_p10)
}
 0x7d4   :  { %949 = dma.vmem_to_hbm [thread:$0]  %s947_s19, 128, %s2059_s6, [#allocation5]  }
 0x7d5   :  { %1626 = dma.done.wait [#allocation5], 128  }
 0x7d6   :  { %1627 = vsyncadd [#allocation5], 4294967168 }
 0x7d7   :  { %953 = vsyncpa [#allocation4], 1 }
 0x7d8   :  { %954 = vsyncpa [#allocation7], 1 }
 0x7d9   :  { %955 = vsyncpa [#allocation10], 1 }
 0x7da   :  { %956 = vsyncpa [#allocation5], 1 }

</bundles_post_ra>
